<compile_context>
chip_gen: v7x
topology: tpu7x:2x2x1
jax: 0.10.0
libtpu: 0.0.40
codegen_flags: <defaults>
</compile_context>

<pallas_src>
import jax
import jax.numpy as jnp
from jax.experimental import pallas as pl
from jax.experimental.pallas import tpu as pltpu

_LANES = 128
_SUBLANES = 8


def _cdiv(a, b):
    return (a + b - 1) // b


def _round_up(a, b):
    return _cdiv(a, b) * b


def _repact_origin_kernel(c_ref, x_ref, o_ref):
    """Folded elementwise mixture of {Identity, ReLU, Hardswish, PReLU}.

    c_ref: SMEM (3,) f32  -- [cpos, cneg, c_h] folded coefficients
    x_ref/o_ref: VMEM (tile_rows, 128) tiles in the input's native dtype
    """
    x = x_ref[...].astype(jnp.float32)
    cpos = c_ref[0]
    cneg = c_ref[1]
    c_h = c_ref[2]

    lin = jnp.where(x >= 0.0, cpos, cneg)          # Identity + ReLU + PReLU merged
    hsw = c_h * jnp.clip(x + 3.0, 0.0, 6.0)        # Hardswish kernel (x factored out)
    o_ref[...] = (x * (lin + hsw)).astype(o_ref.dtype)


def _tiling_params(itemsize):
    """Byte-budget -> (max_tile_rows, sublane_pack, vmem_limit_bytes)."""
    try:
        phys_vmem = int(pltpu.get_tpu_info().vmem_capacity_bytes)
    except Exception:
        phys_vmem = 64 << 20  # conservative fallback: v7x per-TC VMEM
    # ~8 MiB input blocks on 128-MiB-VMEM chips (v5e/v6e), ~6 MiB on 64-MiB v7x.
    block_budget = (8 << 20) if phys_vmem >= (96 << 20) else (6 << 20)
    # in+out each double-buffered => ~4x block bytes; add slack, stay well under
    # physical VMEM (v7x has only 64 MiB per TC -- do not copy a v6e-sized limit).
    vmem_limit = min((phys_vmem * 3) // 4, 4 * block_budget + (8 << 20))
    # Sublane packing: f32 rows pack by 8, bf16 by 16, int8/fp8 by 32.
    pack = _SUBLANES * max(1, 4 // itemsize)
    max_tile_rows = max(pack, (block_budget // (_LANES * itemsize)) // pack * pack)
    return max_tile_rows, pack, int(vmem_limit)


def _folded_coeffs(actor_atn, prelu_weight):
    # Mapping matches the PyTorch forward:
    #   w[0] -> Identity, w[1] -> ReLU, w[2] -> Hardswish, w[3] -> PReLU
    w = actor_atn.astype(jnp.float32)
    a = prelu_weight.astype(jnp.float32).reshape(())
    cpos = w[0] + w[1] + w[3]
    cneg = w[0] + a * w[3]
    c_h = w[2] * (1.0 / 6.0)
    return cpos, cneg, c_h


def repact_origin(x, actor_atn, prelu_weight):
    """Apply RepAct_Origin to `x` (any shape) using a Pallas TPU kernel."""
    orig_shape = x.shape
    orig_dtype = x.dtype
    itemsize = jnp.dtype(orig_dtype).itemsize

    cpos, cneg, c_h = _folded_coeffs(actor_atn, prelu_weight)
    coeffs = jnp.stack([cpos, cneg, c_h])

    xf = x.reshape(-1)
    n = xf.shape[0]

    # 128-aligned main slab (Pallas) + tiny (<128 elem) pure-JAX tail.
    n_tail = n % _LANES
    n_main = n - n_tail
    rows = n_main // _LANES

    out_parts = []

    if rows > 0:
        x2d = (xf[:n_main] if n_tail else xf).reshape(rows, _LANES)

        max_tile_rows, pack, vmem_limit = _tiling_params(itemsize)
        if rows <= max_tile_rows:
            tile_rows = rows          # single block == full dims -> always legal
            num_blocks = 1
        else:
            num_blocks = _cdiv(rows, max_tile_rows)
            if num_blocks % 2:
                num_blocks += 1       # even grid keeps both v7x TCs loaded
            tile_rows = _round_up(_cdiv(rows, num_blocks), pack)
            num_blocks = _cdiv(rows, tile_rows)

        out2d = pl.pallas_call(
            _repact_origin_kernel,
            out_shape=jax.ShapeDtypeStruct((rows, _LANES), orig_dtype),
            grid_spec=pltpu.PrefetchScalarGridSpec(
                num_scalar_prefetch=0,
                grid=(num_blocks,),
                in_specs=[
                    pl.BlockSpec(memory_space=pltpu.SMEM),            # (3,) coeffs
                    pl.BlockSpec((tile_rows, _LANES), lambda i: (i, 0)),
                ],
                out_specs=pl.BlockSpec((tile_rows, _LANES), lambda i: (i, 0)),
            ),
            compiler_params=pltpu.CompilerParams(
                # Lets the grid shard across v7x's 2 TensorCores; no-op on v5e/v6e.
                dimension_semantics=("parallel",),
                vmem_limit_bytes=vmem_limit,
            ),
            cost_estimate=pl.CostEstimate(
                flops=7 * n_main,
                bytes_accessed=2 * n_main * itemsize + 3 * 4,
                transcendentals=0,
            ),
        )(coeffs, x2d)
        out_parts.append(out2d.reshape(-1))

    if n_tail > 0:
        # <128 elements: not worth a kernel launch, compute with the same folded form.
        xt = xf[n_main:].astype(jnp.float32)
        lin = jnp.where(xt >= 0.0, cpos, cneg)
        hsw = c_h * jnp.clip(xt + 3.0, 0.0, 6.0)
        out_parts.append((xt * (lin + hsw)).astype(orig_dtype))

    out = out_parts[0] if len(out_parts) == 1 else jnp.concatenate(out_parts)
    return out.reshape(orig_shape)


def repact_origin_reference(x, actor_atn, prelu_weight):
    """Pure-JAX reference mirroring the PyTorch forward exactly."""
    w = actor_atn.astype(jnp.float32)
    a = prelu_weight.astype(jnp.float32).reshape(())
    xf = x.astype(jnp.float32)
    x_id = xf * w[0]
    x_relu = jnp.maximum(xf, 0.0) * w[1]
    x_hsw = xf * jnp.clip(xf + 3.0, 0.0, 6.0) / 6.0 * w[2]
    x_prelu = jnp.where(xf >= 0.0, xf, a * xf) * w[3]
    return (x_relu + x_id + x_hsw + x_prelu).astype(x.dtype)


if __name__ == "__main__":
    key = jax.random.PRNGKey(0)

    # Parameter init matching the PyTorch module's __init__:
    #   ActorAtn = zeros(4) + 1/4 ; nn.PReLU() default weight = 0.25
    actor_atn = jnp.full((4,), 0.25, dtype=jnp.float32)
    prelu_weight = jnp.full((1,), 0.25, dtype=jnp.float32)

    # Main example input, NCHW like the PyTorch conv-style usage (128-divisible path).
    x = jax.random.normal(key, (2, 4, 16, 16), dtype=jnp.float32)
    out = jax.block_until_ready(repact_origin(x, actor_atn, prelu_weight))
    ref = repact_origin_reference(x, actor_atn, prelu_weight)
    assert out.shape == x.shape and out.dtype == x.dtype
    assert jnp.allclose(out, ref, atol=1e-5, rtol=1e-5), "mismatch vs reference (f32)"

    # Odd-sized input to exercise the aligned-slab + pure-JAX tail path.
    x_odd = jax.random.normal(jax.random.PRNGKey(1), (3, 5, 7, 11), dtype=jnp.float32)
    out_odd = jax.block_until_ready(repact_origin(x_odd, actor_atn, prelu_weight))
    ref_odd = repact_origin_reference(x_odd, actor_atn, prelu_weight)
    assert out_odd.shape == x_odd.shape and out_odd.dtype == x_odd.dtype
    assert jnp.allclose(out_odd, ref_odd, atol=1e-5, rtol=1e-5), "mismatch vs reference (odd)"

    # bf16 input to exercise the dtype-scaled (byte-budget) tiling + fused casts.
    x_bf16 = jax.random.normal(jax.random.PRNGKey(2), (2, 4, 16, 16)).astype(jnp.bfloat16)
    out_bf16 = jax.block_until_ready(repact_origin(x_bf16, actor_atn, prelu_weight))
    ref_bf16 = repact_origin_reference(x_bf16, actor_atn, prelu_weight)
    assert out_bf16.shape == x_bf16.shape and out_bf16.dtype == x_bf16.dtype
    assert jnp.allclose(out_bf16.astype(jnp.float32), ref_bf16.astype(jnp.float32),
                        atol=2e-2, rtol=2e-2), "mismatch vs reference (bf16)"

    print("KERNEL_OK")
</pallas_src>

<mosaic_0001>
module attributes {stable_mosaic.version = 11 : i64} {
  func.func @_repact_origin_kernel(%arg0: i32, %arg1: memref<3xf32, #tpu.memory_space<smem>>, %arg2: memref<16x128xf32, #tpu.memory_space<vmem>>, %arg3: memref<16x128xf32, #tpu.memory_space<vmem>>) attributes {dimension_semantics = [#tpu.dimension_semantics<parallel>], iteration_bounds = array<i64: 1>, scalar_prefetch = 0 : i64, scratch_operands = 0 : i64, tpu.core_type = #tpu.core_type<tc>, window_params = [{transform_indices = @transform_0, window_bounds = array<i64: 3>}, {transform_indices = @transform_1, window_bounds = array<i64: 16, 128>}, {transform_indices = @transform_2, window_bounds = array<i64: 16, 128>}]} {
    %c0 = arith.constant 0 : index
    %c0_0 = arith.constant 0 : index
    %0 = vector.load %arg2[%c0, %c0_0] : memref<16x128xf32, #tpu.memory_space<vmem>>, vector<16x128xf32>
    %c0_1 = arith.constant 0 : index
    %1 = memref.load %arg1[%c0_1] : memref<3xf32, #tpu.memory_space<smem>>
    %c1 = arith.constant 1 : index
    %2 = memref.load %arg1[%c1] : memref<3xf32, #tpu.memory_space<smem>>
    %c2 = arith.constant 2 : index
    %3 = memref.load %arg1[%c2] : memref<3xf32, #tpu.memory_space<smem>>
    %cst = arith.constant 0.000000e+00 : f32
    %4 = vector.broadcast %cst : f32 to vector<16x128xf32>
    %5 = arith.cmpf oge, %0, %4 : vector<16x128xf32>
    %6 = vector.broadcast %1 : f32 to vector<16x128xf32>
    %7 = vector.broadcast %2 : f32 to vector<16x128xf32>
    %8 = arith.select %5, %6, %7 : vector<16x128xi1>, vector<16x128xf32>
    %cst_2 = arith.constant 3.000000e+00 : f32
    %9 = vector.broadcast %cst_2 : f32 to vector<16x128xf32>
    %10 = arith.addf %0, %9 : vector<16x128xf32>
    %cst_3 = arith.constant 0.000000e+00 : f32
    %cst_4 = arith.constant 6.000000e+00 : f32
    %11 = vector.broadcast %cst_3 : f32 to vector<16x128xf32>
    %12 = arith.maximumf %11, %10 : vector<16x128xf32>
    %13 = vector.broadcast %cst_4 : f32 to vector<16x128xf32>
    %14 = arith.minimumf %13, %12 : vector<16x128xf32>
    %15 = vector.broadcast %3 : f32 to vector<16x128xf32>
    %16 = arith.mulf %15, %14 : vector<16x128xf32>
    %17 = arith.addf %8, %16 : vector<16x128xf32>
    %18 = arith.mulf %0, %17 : vector<16x128xf32>
    %c0_5 = arith.constant 0 : index
    %c0_6 = arith.constant 0 : index
    %19 = vector.load %arg3[%c0_5, %c0_6] : memref<16x128xf32, #tpu.memory_space<vmem>>, vector<16x128xf32>
    tpu.vector_store %arg3[%c0_5, %c0_6], %18 {strides = array<i32>} : memref<16x128xf32, #tpu.memory_space<vmem>>, vector<16x128xf32>,
    return
  }
  func.func @transform_0(%arg0: i32) -> i32 {
    %c0_i32 = arith.constant 0 : i32
    %c0_i32_0 = arith.constant 0 : i32
    return %c0_i32 : i32
  }
  func.func @transform_1(%arg0: i32) -> (i32, i32) {
    %c0_i32 = arith.constant 0 : i32
    %c0_i32_0 = arith.constant 0 : i32
    return %arg0, %c0_i32 : i32, i32
  }
  func.func @transform_2(%arg0: i32) -> (i32, i32) {
    %c0_i32 = arith.constant 0 : i32
    %c0_i32_0 = arith.constant 0 : i32
    return %arg0, %c0_i32 : i32, i32
  }
}

</mosaic_0001>

<bundles_post_ra>
// kernel: tpu_custom_call.1
= control target key start
LH: loop header
LB: loop body
LE: loop exit
PB: predicated region body
PF: predicated region fallthrough
CT: control target
= control target key end

     0   :  { %7 = vsyncpa [#allocation5], 0  ;;  %s210_s0 = inlined_call_operand.hbm [shape: f32[3], index: 0, kind: input, shape index: {}]   ;;  %s211_s1 = inlined_call_operand.hbm [shape: f32[16,128], index: 1, kind: input, shape index: {}]   ;;  %s212_s2 = inlined_call_operand.hbm [shape: f32[16,128], index: 2, kind: output, shape index: {}]  }
   0x1   :  { %8 = vsyncpa [#allocation3], 0 }
   0x2   :  { %9 = vsyncpa [#allocation4], 0  ;;  %s88_s11 = scalar_lea.hbm %s210_s0, 16 }
   0x3   :  { %p89_p0 = scmp.ne.s32.totalorder %s210_s0, %s88_s11  ;;  %p92_p1 = scmp.lt.u32.totalorder %s88_s11, %s210_s0 }
   0x5   :  { %p94_p2 = pnand %p92_p1, %p89_p0 }
   0x7   :  { %97 = shalt.err (!%p94_p2)
}
   0x8   :  { %s148_s16 = smov [#allocation2]   ;;  %s149_s19 = smov [#allocation6]  }
   0x9   :  { %17 = dma.hbm_to_smem %s210_s0, 16, %s148_s16, [#allocation5]  }
   0xa   :  { %s23_s20 = sshll.u32 %s149_s19, 4  ;;  %s98_s23 = scalar_lea.hbm %s211_s1, 256  ;;  %s24_s20 = int_to_ptr.vmem [resolvable:$true] %s23_s20 }
   0xb   :  { %p99_p3 = scmp.ne.s32.totalorder %s211_s1, %s98_s23  ;;  %p102_p4 = scmp.lt.u32.totalorder %s98_s23, %s211_s1 }
   0xd   :  { %p104_p5 = pnand %p102_p4, %p99_p3 }
   0xf   :  { %107 = shalt.err (!%p104_p5)
}
  0x10   :  { %s108_s28 = scalar_lea.vmem %s24_s20, 256  ;;  %p113_p7 = scmp.lt.s32.totalorder %s24_s20, %s24_s20 }
  0x11   :  { %p109_p6 = scmp.ne.s32.totalorder %s24_s20, %s108_s28  ;;  %p114_p8 = scmp.lt.s32.totalorder %s108_s28, %s108_s28 }
  0x13   :  { %p115_p9 = por %p114_p8, %p113_p7 }
  0x15   :  { %p116_p10 = pnand %p115_p9, %p109_p6 }
  0x17   :  { %119 = shalt.err (!%p116_p10)
}
  0x18   :  { %s150_s0 = smov 128   ;;  %s151_s29 = smov 8  }
  0x19   :  { %29 = dma.hbm_to_vmem [thread:$0]  %s211_s1, 256, %s24_s20, [#allocation3], %s150_s0, %s150_s0, %s151_s29  }
  0x1a   :  { %142 = dma.done.wait [#allocation5], 16  }
  0x1b   :  { %143 = vsyncadd [#allocation5], 4294967280 }
  0x1c   :  { %144 = dma.done.wait [#allocation3], 256  }
  0x1d   :  { %145 = vsyncadd [#allocation3], 4294967040 }
  0x1e   :  { %36 = sfence }
  0x1f   :  { %v37_v0 = vld [vmem:[#allocation6] sm:$0xff]  ;;  %s39_s4 = sld [smem:[#allocation2]]  ;;  %s81_s5 = sld [smem:[#allocation2 + $0x1]]  ;;  %v38_v1 = vld [vmem:[#allocation6 + $0x8] sm:$0xff] }
  0x20   :  { %s82_s6 = sld [smem:[#allocation2 + $0x2]]  ;;  %v48_v2 = vadd.f32 3.0, %v37_v0  ;;  %v49_v3 = vadd.f32 3.0, %v38_v1  ;;  %vm42_vm0 = vcmp.ge.f32.partialorder %v37_v0, 0.0  ;;  %vm43_vm1 = vcmp.ge.f32.partialorder %v38_v1, 0.0  ;;  %s152_s1 = smov [#allocation7]  }
  0x21   :  { %s68_s7 = sshll.u32 %s152_s1, 4  ;;  %s69_s7 = int_to_ptr.vmem [resolvable:$true] %s68_s7 }
  0x22   :  { %v50_v4 = vmax.f32 %v48_v2, 0.0  ;;  %v51_v5 = vmax.f32 %v49_v3, 0.0  ;;  %s120_s8 = scalar_lea.vmem %s69_s7, 256  ;;  %p125_p12 = scmp.lt.s32.totalorder %s69_s7, %s69_s7 }
  0x23   :  { %p121_p11 = scmp.ne.s32.totalorder %s69_s7, %s120_s8  ;;  %p126_p13 = scmp.lt.s32.totalorder %s120_s8, %s120_s8 }
  0x24   :  { %v52_v6 = vmin.f32 %v50_v4, 6.0  ;;  %v53_v7 = vmin.f32 %v51_v5, 6.0 }
  0x25   :  { %v44_v8 = vstv %s39_s4  ;;  %v45_v9 = vstv %s81_s5  ;;  %p127_p0 = por %p126_p13, %p125_p12 }
  0x26   :  { %v46_v10 = vsel %vm42_vm0, %v44_v8, %v45_v9  ;;  %v54_v11 = vstv %s82_s6  ;;  %v47_v12 = vsel %vm43_vm1, %v44_v8, %v45_v9 }
  0x27   :  { %v55_v13 = vmul.f32 %v54_v11, %v52_v6  ;;  %v56_v14 = vmul.f32 %v54_v11, %v53_v7  ;;  %p128_p1 = pnand %p127_p0, %p121_p11 }
  0x29   :  { %v57_v15 = vadd.f32 %v55_v13, %v46_v10  ;;  %v58_v16 = vadd.f32 %v56_v14, %v47_v12 }
  0x2b   :  { %v59_v17 = vmul.f32 %v57_v15, %v37_v0  ;;  %v60_v18 = vmul.f32 %v58_v16, %v38_v1 }
  0x2d   :  { %61 = vst [vmem:[#allocation7] sm:$0xff] %v59_v17  ;;  %62 = vst [vmem:[#allocation7 + $0x8] sm:$0xff] %v60_v18 }
  0x2e   :  { %131 = shalt.err (!%p128_p1)
}
  0x2f   :  { %s132_s11 = scalar_lea.hbm %s212_s2, 256 }
  0x30   :  { %p133_p2 = scmp.ne.s32.totalorder %s212_s2, %s132_s11  ;;  %p136_p3 = scmp.lt.u32.totalorder %s132_s11, %s212_s2 }
  0x32   :  { %p138_p4 = pnand %p136_p3, %p133_p2 }
  0x34   :  { %141 = shalt.err (!%p138_p4)
}
  0x35   :  { %74 = dma.vmem_to_hbm [thread:$0]  %s69_s7, 256, %s212_s2, [#allocation4], %s150_s0, %s150_s0, %s151_s29  }
  0x36   :  { %146 = dma.done.wait [#allocation4], 256  }
  0x37   :  { %147 = vsyncadd [#allocation4], 4294967040 }
  0x38   :  { %78 = vsyncpa [#allocation3], 1 }
  0x39   :  { %79 = vsyncpa [#allocation4], 1 }
  0x3a   :  { %80 = vsyncpa [#allocation5], 1 }

</bundles_post_ra>
